<compile_context>
chip_gen: v6e
topology: v6e:2x2x1
jax: 0.10.0
libtpu: 0.0.40
codegen_flags: <defaults>
</compile_context>

<pallas_src>
import math
from functools import partial

import jax
import jax.numpy as jnp
from jax.experimental import pallas as pl
from jax.experimental.pallas import tpu as pltpu

# Problem sizes (small, consistent with the module's forward signature (N, D) / (N, L)).
N = 32   # batch of (theta, x) pairs (multi-tile so the grid accumulation path is exercised)
D = 4    # dim of theta
L = 16   # dim of observation x
H = 32   # hidden width of the conditioning network
TN = 8   # batch tile (sublane-aligned)


def _npe_loss_kernel(theta_ref, x_ref, w1_ref, b1_ref,
                     w2mu_ref, b2mu_ref, w2ls_ref, b2ls_ref,
                     out_ref, *, inv_n, const):
    """Per-batch-tile body. Accumulates sum_{i,d}(0.5 z^2 + log_sigma) into SMEM."""
    i = pl.program_id(0)

    @pl.when(i == 0)
    def _():
        out_ref[0, 0] = jnp.float32(0.0)

    theta = theta_ref[...]                                 # (TN, D) f32
    x = x_ref[...]                                         # (TN, L) f32

    # Conditioning network. (For big batches on v6e/v7x: cast x/h and the weights to
    # bfloat16 here, keeping preferred_element_type=f32; keep f32 on v5e.)
    h = jnp.tanh(
        jnp.dot(x, w1_ref[...], preferred_element_type=jnp.float32) + b1_ref[...]
    )                                                      # (TN, H)
    mu = jnp.dot(h, w2mu_ref[...], preferred_element_type=jnp.float32) + b2mu_ref[...]
    log_sigma = jnp.dot(h, w2ls_ref[...], preferred_element_type=jnp.float32) + b2ls_ref[...]

    # Diagonal-Gaussian flow negative log-density (constant term folded into the epilogue).
    z = (theta - mu) * jnp.exp(-log_sigma)                 # (TN, D); exp on EUP slot
    out_ref[0, 0] += jnp.sum(0.5 * (z * z) + log_sigma)    # single XLU full-tile reduce

    @pl.when(i == pl.num_programs(0) - 1)
    def _():
        # l = (1/N) * total + 0.5 * D * log(2*pi)
        out_ref[0, 0] = out_ref[0, 0] * inv_n + const


def npe_loss(theta, x, w1, b1, w2, b2, *, tn=None):
    n, d = theta.shape
    _, l = x.shape
    h = w1.shape[1]

    if tn is None:
        tn = min(n, 1024)
    assert n % tn == 0 and (tn % 8 == 0 or tn == n), "batch tile must align to sublanes"

    # Split the affine head wrapper-side so the kernel never slices at a sub-lane offset.
    w2_mu, w2_ls = w2[:, :d], w2[:, d:]
    b2_mu, b2_ls = b2[:, :d], b2[:, d:]

    kernel = partial(
        _npe_loss_kernel,
        inv_n=1.0 / float(n),
        const=0.5 * float(d) * math.log(2.0 * math.pi),
    )

    out = pl.pallas_call(
        kernel,
        out_shape=jax.ShapeDtypeStruct((1, 1), jnp.float32),
        grid_spec=pltpu.PrefetchScalarGridSpec(
            num_scalar_prefetch=0,
            grid=(n // tn,),
            in_specs=[
                pl.BlockSpec((tn, d), lambda i: (i, 0)),   # theta: streamed per tile
                pl.BlockSpec((tn, l), lambda i: (i, 0)),   # x:     streamed per tile
                pl.BlockSpec((l, h), lambda i: (0, 0)),    # W1:    resident
                pl.BlockSpec((1, h), lambda i: (0, 0)),    # b1:    resident
                pl.BlockSpec((h, d), lambda i: (0, 0)),    # W2_mu: resident
                pl.BlockSpec((1, d), lambda i: (0, 0)),    # b2_mu: resident
                pl.BlockSpec((h, d), lambda i: (0, 0)),    # W2_ls: resident
                pl.BlockSpec((1, d), lambda i: (0, 0)),    # b2_ls: resident
            ],
            # Scalar loss lives in SMEM: no masked vector store, no padded VMEM tile.
            out_specs=pl.BlockSpec(memory_space=pltpu.MemorySpace.SMEM),
        ),
        compiler_params=pltpu.CompilerParams(
            dimension_semantics=("arbitrary",),  # serial accumulation over batch tiles
        ),
    )(theta, x, w1, b1, w2_mu, b2_mu, w2_ls, b2_ls)
    return out[0, 0]


def npe_loss_ref(theta, x, w1, b1, w2, b2):
    """Pure-JAX reference for verification."""
    d = theta.shape[1]
    h = jnp.tanh(x @ w1 + b1)
    params = h @ w2 + b2
    mu, log_sigma = params[:, :d], params[:, d:]
    z = (theta - mu) * jnp.exp(-log_sigma)
    log_p = jnp.sum(
        -0.5 * z * z - 0.5 * math.log(2.0 * math.pi) - log_sigma, axis=-1
    )
    return -jnp.mean(log_p)


if __name__ == "__main__":
    key = jax.random.PRNGKey(0)
    k_theta, k_x, k_w1, k_b1, k_w2, k_b2 = jax.random.split(key, 6)

    # Example inputs: theta (N, D), x (N, L)
    theta = jax.random.normal(k_theta, (N, D), dtype=jnp.float32)
    x = jax.random.normal(k_x, (N, L), dtype=jnp.float32)

    # Deterministic synthetic estimator parameters (fan-in scaled).
    w1 = jax.random.normal(k_w1, (L, H), dtype=jnp.float32) / math.sqrt(L)
    b1 = 0.01 * jax.random.normal(k_b1, (1, H), dtype=jnp.float32)
    w2 = jax.random.normal(k_w2, (H, 2 * D), dtype=jnp.float32) / math.sqrt(H)
    b2 = 0.01 * jax.random.normal(k_b2, (1, 2 * D), dtype=jnp.float32)

    loss = jax.block_until_ready(npe_loss(theta, x, w1, b1, w2, b2, tn=TN))
    ref = jax.block_until_ready(npe_loss_ref(theta, x, w1, b1, w2, b2))

    assert jnp.allclose(loss, ref, rtol=1e-5, atol=1e-5), (loss, ref)
    print("KERNEL_OK")
</pallas_src>

<mosaic_0001>
module attributes {stable_mosaic.version = 11 : i64} {
  func.func @_npe_loss_kernel(%arg0: i32, %arg1: memref<8x4xf32, #tpu.memory_space<vmem>>, %arg2: memref<8x16xf32, #tpu.memory_space<vmem>>, %arg3: memref<16x32xf32, #tpu.memory_space<vmem>>, %arg4: memref<1x32xf32, #tpu.memory_space<vmem>>, %arg5: memref<32x4xf32, #tpu.memory_space<vmem>>, %arg6: memref<1x4xf32, #tpu.memory_space<vmem>>, %arg7: memref<32x4xf32, #tpu.memory_space<vmem>>, %arg8: memref<1x4xf32, #tpu.memory_space<vmem>>, %arg9: memref<1x1xf32, #tpu.memory_space<smem>>) attributes {dimension_semantics = [#tpu.dimension_semantics<arbitrary>], iteration_bounds = array<i64: 4>, scalar_prefetch = 0 : i64, scratch_operands = 0 : i64, tpu.core_type = #tpu.core_type<tc>, window_params = [{transform_indices = @transform_0, window_bounds = array<i64: 8, 4>}, {transform_indices = @transform_1, window_bounds = array<i64: 8, 16>}, {pipeline_mode = #tpu.pipeline_mode<synchronous>, transform_indices = @transform_2, window_bounds = array<i64: 16, 32>}, {pipeline_mode = #tpu.pipeline_mode<synchronous>, transform_indices = @transform_3, window_bounds = array<i64: 1, 32>}, {pipeline_mode = #tpu.pipeline_mode<synchronous>, transform_indices = @transform_4, window_bounds = array<i64: 32, 4>}, {pipeline_mode = #tpu.pipeline_mode<synchronous>, transform_indices = @transform_5, window_bounds = array<i64: 1, 4>}, {pipeline_mode = #tpu.pipeline_mode<synchronous>, transform_indices = @transform_6, window_bounds = array<i64: 32, 4>}, {pipeline_mode = #tpu.pipeline_mode<synchronous>, transform_indices = @transform_7, window_bounds = array<i64: 1, 4>}, {transform_indices = @transform_8, window_bounds = array<i64: 1, 1>}]} {
    %c0_i32 = arith.constant 0 : i32
    %0 = arith.cmpi eq, %arg0, %c0_i32 : i32
    %1 = arith.extui %0 : i1 to i32
    %c0_i32_0 = arith.constant 0 : i32
    %2 = arith.cmpi ne, %1, %c0_i32_0 : i32
    scf.if %2 {
      %cst_26 = arith.constant 0.000000e+00 : f32
      %c0_27 = arith.constant 0 : index
      %c0_28 = arith.constant 0 : index
      %40 = memref.load %arg9[%c0_27, %c0_28] : memref<1x1xf32, #tpu.memory_space<smem>>
      memref.store %cst_26, %arg9[%c0_27, %c0_28] : memref<1x1xf32, #tpu.memory_space<smem>>
    } else {
    }
    %c0 = arith.constant 0 : index
    %c0_1 = arith.constant 0 : index
    %3 = vector.load %arg1[%c0, %c0_1] : memref<8x4xf32, #tpu.memory_space<vmem>>, vector<8x4xf32>
    %c0_2 = arith.constant 0 : index
    %c0_3 = arith.constant 0 : index
    %4 = vector.load %arg2[%c0_2, %c0_3] : memref<8x16xf32, #tpu.memory_space<vmem>>, vector<8x16xf32>
    %c0_4 = arith.constant 0 : index
    %c0_5 = arith.constant 0 : index
    %5 = vector.load %arg3[%c0_4, %c0_5] : memref<16x32xf32, #tpu.memory_space<vmem>>, vector<16x32xf32>
    %cst = arith.constant dense<0.000000e+00> : vector<8x32xf32>
    %6 = tpu.matmul %4, %5, %cst {dimension_numbers = #tpu.dot_dimension_numbers<[1], [0], [0], [1], [0, 0, 1, 1], [], []>} : vector<8x16xf32>, vector<16x32xf32>, vector<8x32xf32> -> vector<8x32xf32>
    %c0_6 = arith.constant 0 : index
    %c0_7 = arith.constant 0 : index
    %7 = vector.load %arg4[%c0_6, %c0_7] : memref<1x32xf32, #tpu.memory_space<vmem>>, vector<1x32xf32>
    %8 = vector.broadcast %7 : vector<1x32xf32> to vector<8x32xf32>
    %9 = arith.addf %6, %8 : vector<8x32xf32>
    %10 = math.tanh %9 : vector<8x32xf32>
    %c0_8 = arith.constant 0 : index
    %c0_9 = arith.constant 0 : index
    %11 = vector.load %arg5[%c0_8, %c0_9] : memref<32x4xf32, #tpu.memory_space<vmem>>, vector<32x4xf32>
    %cst_10 = arith.constant dense<0.000000e+00> : vector<8x4xf32>
    %12 = tpu.matmul %10, %11, %cst_10 {dimension_numbers = #tpu.dot_dimension_numbers<[1], [0], [0], [1], [0, 0, 1, 1], [], []>} : vector<8x32xf32>, vector<32x4xf32>, vector<8x4xf32> -> vector<8x4xf32>
    %c0_11 = arith.constant 0 : index
    %c0_12 = arith.constant 0 : index
    %13 = vector.load %arg6[%c0_11, %c0_12] : memref<1x4xf32, #tpu.memory_space<vmem>>, vector<1x4xf32>
    %14 = vector.broadcast %13 : vector<1x4xf32> to vector<8x4xf32>
    %15 = arith.addf %12, %14 : vector<8x4xf32>
    %c0_13 = arith.constant 0 : index
    %c0_14 = arith.constant 0 : index
    %16 = vector.load %arg7[%c0_13, %c0_14] : memref<32x4xf32, #tpu.memory_space<vmem>>, vector<32x4xf32>
    %cst_15 = arith.constant dense<0.000000e+00> : vector<8x4xf32>
    %17 = tpu.matmul %10, %16, %cst_15 {dimension_numbers = #tpu.dot_dimension_numbers<[1], [0], [0], [1], [0, 0, 1, 1], [], []>} : vector<8x32xf32>, vector<32x4xf32>, vector<8x4xf32> -> vector<8x4xf32>
    %c0_16 = arith.constant 0 : index
    %c0_17 = arith.constant 0 : index
    %18 = vector.load %arg8[%c0_16, %c0_17] : memref<1x4xf32, #tpu.memory_space<vmem>>, vector<1x4xf32>
    %19 = vector.broadcast %18 : vector<1x4xf32> to vector<8x4xf32>
    %20 = arith.addf %17, %19 : vector<8x4xf32>
    %21 = arith.subf %3, %15 : vector<8x4xf32>
    %cst_18 = arith.constant 0.000000e+00 : f32
    %22 = vector.broadcast %cst_18 : f32 to vector<8x4xf32>
    %23 = arith.subf %22, %20 : vector<8x4xf32>
    %24 = math.exp %23 : vector<8x4xf32>
    %25 = arith.mulf %21, %24 : vector<8x4xf32>
    %c0_19 = arith.constant 0 : index
    %c0_20 = arith.constant 0 : index
    %26 = memref.load %arg9[%c0_19, %c0_20] : memref<1x1xf32, #tpu.memory_space<smem>>
    %27 = arith.mulf %25, %25 : vector<8x4xf32>
    %cst_21 = arith.constant 5.000000e-01 : f32
    %28 = vector.broadcast %cst_21 : f32 to vector<8x4xf32>
    %29 = arith.mulf %28, %27 : vector<8x4xf32>
    %30 = arith.addf %29, %20 : vector<8x4xf32>
    %31 = vector.shape_cast %30 : vector<8x4xf32> to vector<1x8x4xf32>
    %cst_22 = arith.constant dense<0.000000e+00> : vector<1xf32>
    %32 = vector.multi_reduction <add>, %31, %cst_22 [1, 2] : vector<1x8x4xf32> to vector<1xf32>
    %33 = vector.shape_cast %32 : vector<1xf32> to vector<1x1x1xf32>
    %34 = vector.extract %33[0, 0, 0] : f32 from vector<1x1x1xf32>
    %35 = arith.addf %26, %34 : f32
    %c0_23 = arith.constant 0 : index
    %c0_24 = arith.constant 0 : index
    %36 = memref.load %arg9[%c0_23, %c0_24] : memref<1x1xf32, #tpu.memory_space<smem>>
    memref.store %35, %arg9[%c0_23, %c0_24] : memref<1x1xf32, #tpu.memory_space<smem>>
    %c3_i32 = arith.constant 3 : i32
    %37 = arith.cmpi eq, %arg0, %c3_i32 : i32
    %38 = arith.extui %37 : i1 to i32
    %c0_i32_25 = arith.constant 0 : i32
    %39 = arith.cmpi ne, %38, %c0_i32_25 : i32
    scf.if %39 {
      %c0_26 = arith.constant 0 : index
      %c0_27 = arith.constant 0 : index
      %40 = memref.load %arg9[%c0_26, %c0_27] : memref<1x1xf32, #tpu.memory_space<smem>>
      %cst_28 = arith.constant 3.125000e-02 : f32
      %41 = arith.mulf %40, %cst_28 : f32
      %cst_29 = arith.constant 3.67575407 : f32
      %42 = arith.addf %41, %cst_29 : f32
      %c0_30 = arith.constant 0 : index
      %c0_31 = arith.constant 0 : index
      %43 = memref.load %arg9[%c0_30, %c0_31] : memref<1x1xf32, #tpu.memory_space<smem>>
      memref.store %42, %arg9[%c0_30, %c0_31] : memref<1x1xf32, #tpu.memory_space<smem>>
    } else {
    }
    return
  }
  func.func @transform_0(%arg0: i32) -> (i32, i32) {
    %c0_i32 = arith.constant 0 : i32
    %c0_i32_0 = arith.constant 0 : i32
    return %arg0, %c0_i32 : i32, i32
  }
  func.func @transform_1(%arg0: i32) -> (i32, i32) {
    %c0_i32 = arith.constant 0 : i32
    %c0_i32_0 = arith.constant 0 : i32
    return %arg0, %c0_i32 : i32, i32
  }
  func.func @transform_2(%arg0: i32) -> (i32, i32) {
    %c0_i32 = arith.constant 0 : i32
    %c0_i32_0 = arith.constant 0 : i32
    %c0_i32_1 = arith.constant 0 : i32
    return %c0_i32, %c0_i32_0 : i32, i32
  }
  func.func @transform_3(%arg0: i32) -> (i32, i32) {
    %c0_i32 = arith.constant 0 : i32
    %c0_i32_0 = arith.constant 0 : i32
    %c0_i32_1 = arith.constant 0 : i32
    return %c0_i32, %c0_i32_0 : i32, i32
  }
  func.func @transform_4(%arg0: i32) -> (i32, i32) {
    %c0_i32 = arith.constant 0 : i32
    %c0_i32_0 = arith.constant 0 : i32
    %c0_i32_1 = arith.constant 0 : i32
    return %c0_i32, %c0_i32_0 : i32, i32
  }
  func.func @transform_5(%arg0: i32) -> (i32, i32) {
    %c0_i32 = arith.constant 0 : i32
    %c0_i32_0 = arith.constant 0 : i32
    %c0_i32_1 = arith.constant 0 : i32
    return %c0_i32, %c0_i32_0 : i32, i32
  }
  func.func @transform_6(%arg0: i32) -> (i32, i32) {
    %c0_i32 = arith.constant 0 : i32
    %c0_i32_0 = arith.constant 0 : i32
    %c0_i32_1 = arith.constant 0 : i32
    return %c0_i32, %c0_i32_0 : i32, i32
  }
  func.func @transform_7(%arg0: i32) -> (i32, i32) {
    %c0_i32 = arith.constant 0 : i32
    %c0_i32_0 = arith.constant 0 : i32
    %c0_i32_1 = arith.constant 0 : i32
    return %c0_i32, %c0_i32_0 : i32, i32
  }
  func.func @transform_8(%arg0: i32) -> (i32, i32) {
    %c0_i32 = arith.constant 0 : i32
    %c0_i32_0 = arith.constant 0 : i32
    %c0_i32_1 = arith.constant 0 : i32
    return %c0_i32, %c0_i32_0 : i32, i32
  }
}

</mosaic_0001>

<bundles_post_ra>
// kernel: tpu_custom_call.1
= control target key start
LH: loop header
LB: loop body
LE: loop exit
PB: predicated region body
PF: predicated region fallthrough
CT: control target
= control target key end

     0   :  { %13 = vsyncpa [#allocation3], 0  ;;  %s813_s27 = smov 0   ;;  %s885_s0 = inlined_call_operand.vmem [shape: f32[32,4], index: 0, kind: input, shape index: {}]   ;;  %s886_s1 = inlined_call_operand.vmem [shape: f32[32,16], index: 1, kind: input, shape index: {}]   ;;  %s887_s2 = inlined_call_operand.vmem [shape: f32[16,32], index: 2, kind: input, shape index: {}]   ;;  %s888_s3 = inlined_call_operand.vmem [shape: f32[1,32], index: 3, kind: input, shape index: {}]   ;;  %s889_s4 = inlined_call_operand.vmem [shape: f32[32,4], index: 4, kind: input, shape index: {}]   ;;  %s890_s5 = inlined_call_operand.vmem [shape: f32[1,4], index: 5, kind: input, shape index: {}]   ;;  %s891_s6 = inlined_call_operand.vmem [shape: f32[32,4], index: 6, kind: input, shape index: {}]   ;;  %s892_s7 = inlined_call_operand.vmem [shape: f32[1,4], index: 7, kind: input, shape index: {}]   ;;  %s893_s8 = inlined_call_operand.hbm [shape: f32[1,1], index: 8, kind: output, shape index: {}]  }
   0x1 LB: > { %s819_s28 = sadd.s32 4294967295, %s762_s27   ;;  %p655_p0 = scmp.ge.s32.totalorder %s762_s27, 1  ;;  %s762_s27 = sphi %s813_s27, %s19_s27  }
   0x2   : > { %p266_p1 = scmp.lt.s32.totalorder %s762_s27, 5 }
   0x4   : > { %p267_p2 = pnand %p655_p0, %p266_p1 }
   0x5   : > { %p298_p3 = scmp.lt.s32.totalorder (!%p267_p2), %s819_s28, 3  ;;  %p722_p4 = scmp.eq.s32.totalorder (!%p267_p2), %s819_s28, 0 }
   0x6   : > { %270 = sbr.rel (%p267_p2) target bundleno = 658 (0x292), region = 52  ;;  %s766_s23 = smov (!%p267_p2), 0.0  }
   0x7   : > { %p723_p5 = scmp.eq.s32.totalorder (!%p267_p2), %s819_s28, 3  ;;  %s767_s29 = smov (!%p267_p2), [#allocation2]  }
   0xb   : > { %v315_v0 = vld [vmem:[%s887_s2 + $0x8] sm:$0xff]  ;;  %v764_v1 = vmov 0.0   ;;  %v314_v2 = vld [vmem:[%s887_s2] sm:$0xff]  ;;  %vm765_vm0 = vmmov 0   ;;  %s831_s11 = scalar_select %p298_p3, %s819_s28, 3  ;;  %vm323_vm1 = vcmask 130048  }
   0xc   : > { %683 = vmatprep.subr.mxu0 %v764_v1  ;;  %687 = vmatprep.mubr.msk.f32.mxu0 %vm765_vm0, %v764_v1  ;;  %v401_v4 = vld [vmem:[%s889_s4 + $0x18] sm:$0xff]  ;;  %v400_v6 = vld [vmem:[%s889_s4 + $0x10] sm:$0xff]  ;;  %v399_v8 = vld [vmem:[%s889_s4 + $0x8] sm:$0xff]  ;;  %vm409_vm2 = vcmask 261120   ;;  %vm573_vm3 = vcmask 31744   ;;  %715 = sst [smem:[#allocation2]] (%p722_p4), %s766_s23 }
   0xd   : > { %684 = vmatpush3.msra.mxu0 %v315_v0  ;;  %690 = vmatprep.subr.mxu1 %v764_v1  ;;  %s656_s12 = sshll.u32 %s831_s11, 3  ;;  %v486_v5 = vld [vmem:[%s891_s6 + $0x18] sm:$0xff]  ;;  %v485_v7 = vld [vmem:[%s891_s6 + $0x10] sm:$0xff]  ;;  %v484_v9 = vld [vmem:[%s891_s6 + $0x8] sm:$0xff]  ;;  %s569_s11 = sld [smem:[#allocation2]] }
   0xe   : > { %685 = vmatprep.subr.mxu0 %v764_v1  ;;  %698 = vmatprep.mubr.msk.f32.mxu1 %vm765_vm0, %v764_v1  ;;  %s305_s15 = scalar_lea.vmem %s886_s1, %s656_s12  ;;  %v398_v10 = vld [vmem:[%s889_s4] sm:$0xff]  ;;  %s301_s22 = scalar_lea.vmem %s885_s0, %s656_s12 }
   0xf   : > { %686 = vmatpush3.msra.mxu0 %v314_v2  ;;  %v313_v3 = vld [vmem:[%s305_s15] sm:$0xff]  ;;  %691 = vmatpush3.msra.mxu1 %v401_v4 }
  0x10   : > { %701 = vmatprep.subr.mxu0 %v764_v1  ;;  %688 = vmatmul.mubr.msk.f32.vlgmr.msra.gmra.mxu0 %vm323_vm1, %v313_v3  ;;  %v483_v11 = vld [vmem:[%s891_s6] sm:$0xff] }
  0x11   : > { %709 = vmatprep.mubr.msk.f32.mxu0 %vm765_vm0, %v764_v1  ;;  %702 = vmatpush3.msra.mxu0 %v486_v5  ;;  %v659_v12 = vld [vmem:[%s888_s3] ss:$0 sm:$0xff] }
  0x12   : > { %692 = vmatprep.subr.mxu1 %v764_v1  ;;  %703 = vmatprep.subr.mxu0 %v764_v1  ;;  %v663_v17 = vld [vmem:[%s892_s7] ss:$0 sm:$0xff] }
  0x13   : > { %693 = vmatpush3.msra.mxu1 %v400_v6  ;;  %704 = vmatpush3.msra.mxu0 %v485_v7  ;;  %v661_v25 = vld [vmem:[%s890_s5] ss:$0 sm:$0xff] }
  0x14   : > { %694 = vmatprep.subr.mxu1 %v764_v1  ;;  %705 = vmatprep.subr.mxu0 %v764_v1  ;;  %v312_v27 = vld [vmem:[%s301_s22] sm:$0xff] }
  0x15   : > { %695 = vmatpush3.msra.mxu1 %v399_v8  ;;  %706 = vmatpush3.msra.mxu0 %v484_v9 }
  0x16   : > { %696 = vmatprep.subr.mxu1 %v764_v1  ;;  %707 = vmatprep.subr.mxu0 %v764_v1 }
  0x17   : > { %697 = vmatpush3.msra.mxu1 %v398_v10  ;;  %708 = vmatpush3.msra.mxu0 %v483_v11 }
  0xd0   : > { %v393_v13 = vpop.f32.mrf.mxu0 }
  0xd1   : > { %v394_v14 = vadd.f32 %v659_v12, %v393_v13 }
  0xd2   : > { %v689_v15 = vpop.f32.mrf.mxu0 }
  0xd3   : > { %738 = vtanh.f32 %v394_v14 }
  0xe0   : > { %v739_v16 = vpop.eup %738 }
  0xe1   : > { %699 = vmatmul.mubr.msk.f32.vlgmr.msra.gmra.mxu1 %vm409_vm2, %v739_v16  ;;  %710 = vmatmul.mubr.msk.f32.vlgmr.msra.gmra.mxu0 %vm409_vm2, %v739_v16 }
 0x1a1   : > { %v479_v18 = vpop.f32.mrf.mxu1  ;;  %v560_v19 = vpop.f32.mrf.mxu0 }
 0x1a2   : > { %v561_v20 = vadd.f32 %v663_v17, %v560_v19  ;;  %v480_v26 = vadd.f32 %v661_v25, %v479_v18 }
 0x1a3   : > { %v700_v21 = vpop.f32.mrf.mxu1  ;;  %v711_v22 = vpop.f32.mrf.mxu0 }
 0x1a4   : > { %v565_v23 = vsub.f32 0.0, %v561_v20  ;;  %v564_v28 = vsub.f32 %v312_v27, %v480_v26 }
 0x1a6   : > { %v566_v24 = vmul.f32 1.442695, %v565_v23 }
 0x1a8   : > { %740 = vpow2.f32 %v566_v24 }
 0x1b5   : > { %v741_v29 = vpop.eup %740 }
 0x1b6   : > { %v568_v30 = vmul.f32 %v741_v29, %v564_v28 }
 0x1b8   : > { %v570_v31 = vmul.f32 %v568_v30, %v568_v30 }
 0x1ba   : > { %v571_v32 = vmul.f32 0.5, %v570_v31 }
 0x1bc   : > { %v572_v33 = vadd.f32 %v571_v32, %v561_v20 }
 0x1be   : > { %v574_v34 = vsel %vm573_vm3, %v572_v33, 0.0 }
 0x1bf   : > { %575 = vadd.xlane.f32.xlu0 %v574_v34 }
 0x248   : > { %v576_v35 = vpop.xlane.xlu0 %575 }
 0x249   : > { %v577_v36 = vrot.slane %v576_v35, 4 }
 0x24b   : > { %v578_v37 = vadd.f32 %v577_v36, %v576_v35 }
 0x24d   : > { %v579_v38 = vrot.slane %v578_v37, 2 }
 0x24f   : > { %v580_v39 = vadd.f32 %v579_v38, %v578_v37 }
 0x251   : > { %v581_v40 = vrot.slane %v580_v39, 1 }
 0x253   : > { %v582_v41 = vadd.f32 %v581_v40, %v580_v39 }
 0x255   : > { %712 = vpush %v582_v41 }
 0x286   : > { %s713_s12 = spop %712 }
 0x287   : > { %s584_s24 = sadd.f32 %s713_s12, %s569_s11 }
 0x289   : > { %586 = sst [smem:[#allocation2]] %s584_s24  ;;  %s592_s25 = smul.f32 0.03125, %s584_s24 }
 0x28b   : > { %s593_s26 = sadd.f32 3.675754, %s592_s25 }
 0x28d   : > { %717 = sst [smem:[#allocation2]] (%p723_p5), %s593_s26 }
 0x28e   : > { %719 = dma.smem_to_hbm (%p723_p5), %s767_s29, 16, %s893_s8, [#allocation3]  }
 0x28f   : > { %757 = dma.done.wait (%p723_p5), [#allocation3], 16  }
 0x290   : > { %759 = vsyncadd (%p723_p5), [#allocation3], 4294967280 }
 0x291   : > { %608 = sfence }
 0x292 PF: > { %s19_s27 = sadd.s32 1, %s762_s27  }
 0x293   : > { %p16_p6 = scmp.ge.s32.totalorder %s19_s27, 6  }
 0x295   :  { %18 = sbr.rel (!%p16_p6) target bundleno = 1 (0x1), region = 92 }
 0x29a   :  { %614 = vsyncpa [#allocation3], 1 }
 0x29b   :  { %616 = vsyncpa [#allocation3 + $0x1], 1 }

</bundles_post_ra>
